<compile_context>
chip_gen: v7x
topology: tpu7x:2x2x1
jax: 0.10.0
libtpu: 0.0.40
codegen_flags: <defaults>
</compile_context>

<pallas_src>
import functools

import jax
import jax.numpy as jnp
from jax.experimental import pallas as pl
from jax.experimental.pallas import tpu as pltpu


def _round_up(x, m):
    return (x + m - 1) // m * m


def ncf_kernel(u_idx_ref, i_idx_ref, up_ref, ip_ref, b1_ref, w2_ref, b2_ref,
               o_ref):
    """Batch-on-lanes NCF forward for one batch tile.

    u_idx_ref/i_idx_ref: (1, TB) int32          lane-dense index blocks
    up_ref: (2*Hp, VUp) bf16   rows [0:Hp]=hi, [Hp:2Hp]=lo of (user_emb@W1u).T
    ip_ref: (2*Hp, VIp) bf16   same packing for the item side
    b1_ref: (Hp, 1) f32, w2_ref: (Hp, 1) f32, b2_ref: (1, 1) f32
    o_ref:  (1, TB) f32
    """
    tb = u_idx_ref.shape[1]
    vu = up_ref.shape[1]
    vi = ip_ref.shape[1]
    hp = b1_ref.shape[0]

    # Transposed one-hot gather masks (V, TB): column r has a single 1.0 at
    # row idx[r].  Built directly lane-dense (no reshape of the index block)
    # and cast to bf16 so the gather matmuls take the fast bf16 MXU path.
    # TODO(synk): for vocabularies whose packed projection no longer fits
    # VMEM, chunk the vocab axis with an inner fori_loop (accumulate partial
    # gathers) or switch to a manual-DMA gather from a pl.ANY HBM ref.
    u_oh = jnp.where(
        jax.lax.broadcasted_iota(jnp.int32, (vu, tb), 0) == u_idx_ref[...],
        1.0, 0.0).astype(jnp.bfloat16)
    i_oh = jnp.where(
        jax.lax.broadcasted_iota(jnp.int32, (vi, tb), 0) == i_idx_ref[...],
        1.0, 0.0).astype(jnp.bfloat16)

    # Fused "embedding lookup + first linear": tables already hold the hidden
    # projection, so each gather matmul lands directly in hidden space.
    # One-hot row selection with f32 accumulation is exact.
    gu = jnp.dot(up_ref[...], u_oh, preferred_element_type=jnp.float32)  # (2Hp, TB)
    gi = jnp.dot(ip_ref[...], i_oh, preferred_element_type=jnp.float32)  # (2Hp, TB)

    # Recombine hi+lo planes (x == hi+lo to ~2^-18 relative) and finish layer 1.
    h = gu[:hp] + gu[hp:] + gi[:hp] + gi[hp:] + b1_ref[...]              # (Hp, TB)
    h = jnp.maximum(h, 0.0)                                              # ReLU

    # TODO(synk): embedding_dropout / linear_dropout are identity at inference.

    # Final 1-wide linear: VPU multiply + sublane reduction (padded rows of w2
    # are 0.0, so padding contributes nothing).  Lane-dense (1, TB) store.
    out = jnp.sum(h * w2_ref[...], axis=0, keepdims=True) + b2_ref[...]  # (1, TB)
    o_ref[...] = out.astype(o_ref.dtype)


@functools.partial(jax.jit, static_argnames=("y_range", "block_b"))
def ncf_forward(users, items, params, y_range=None, block_b=1024):
    """users, items: int32 (B,) index vectors."""
    B = users.shape[0]
    F = params["user_emb"].shape[1]
    H = params["b1"].shape[-1]

    h_pad = _round_up(H, 128)
    vu_pad = _round_up(params["user_emb"].shape[0], 128)
    vi_pad = _round_up(params["item_emb"].shape[0], 128)

    def pad2(a, r, c):
        return jnp.pad(a, ((0, r - a.shape[0]), (0, c - a.shape[1])))

    # ---- Hoisted fusion: precompute emb @ W1_half once per vocab row (f32,
    # highest precision), so the kernel gathers straight into hidden space.
    w1 = params["w1"]                                           # (2F, H) f32
    up = jnp.dot(params["user_emb"].astype(jnp.float32), w1[:F],
                 precision=jax.lax.Precision.HIGHEST)           # (VU, H)
    ip = jnp.dot(params["item_emb"].astype(jnp.float32), w1[F:],
                 precision=jax.lax.Precision.HIGHEST)           # (VI, H)
    up_t = pad2(up.T, h_pad, vu_pad)                            # (Hp, VUp) f32
    ip_t = pad2(ip.T, h_pad, vi_pad)                            # (Hp, VIp) f32

    # bf16 hi/lo split: keeps the gather matmuls on the bf16 MXU path while
    # staying within ~2^-18 relative of the f32 projection values.
    def hi_lo_pack(x):
        hi = x.astype(jnp.bfloat16)
        lo = (x - hi.astype(jnp.float32)).astype(jnp.bfloat16)
        return jnp.concatenate([hi, lo], axis=0)                # (2Hp, Vp) bf16

    up_pack = hi_lo_pack(up_t)
    ip_pack = hi_lo_pack(ip_t)

    b1_col = pad2(params["b1"].reshape(H, 1), h_pad, 1)         # (Hp, 1), tail 0
    w2_col = pad2(params["w2"], h_pad, 1)                       # (Hp, 1), tail 0
    b2 = params["b2"]                                           # (1, 1)

    # ---- Batch tiling: lane-dense (1, TB) index/output blocks.  Ensure >= 2
    # tiles whenever the batch allows so v7x's two TensorCores both get work
    # (harmless on single-core v5e/v6e).
    block_b = _round_up(block_b, 128)
    b_ceil = _round_up(B, 128)
    tb = min(block_b, max(128, _round_up(b_ceil // 2, 128)))
    b_pad = _round_up(b_ceil, tb)
    grid = (b_pad // tb,)
    u_idx = jnp.pad(users.astype(jnp.int32), (0, b_pad - B)).reshape(1, b_pad)
    i_idx = jnp.pad(items.astype(jnp.int32), (0, b_pad - B)).reshape(1, b_pad)

    # ---- Explicit VMEM budget (double-buffered streams + resident tables +
    # in-kernel intermediates), generous headroom; capped well under physical.
    vmem_est = (
        2 * 2 * (2 * h_pad) * (vu_pad + vi_pad)       # packed tables, bf16, 2 bufs
        + 2 * 3 * 8 * tb * 4                          # (1,TB) idx/out blocks, 2 bufs
        + (vu_pad + vi_pad) * tb * (2 + 4)            # one-hots (bf16) + iota temps
        + 6 * h_pad * tb * 4                          # gu, gi, h f32 intermediates
        + (2 * h_pad + 8) * 128 * 4                   # b1/w2/b2 blocks (lane-padded)
    )
    vmem_limit = int(min(100 * 1024 * 1024,
                         max(32 * 1024 * 1024, 2 * vmem_est)))

    flops = 2 * b_pad * (2 * h_pad) * (vu_pad + vi_pad) + 4 * b_pad * h_pad
    bytes_accessed = (
        u_idx.size * 4 + i_idx.size * 4
        + grid[0] * (up_pack.size + ip_pack.size) * 2
        + (2 * h_pad + 1) * 4 + b_pad * 4)
    cost = pl.CostEstimate(flops=flops, transcendentals=0,
                           bytes_accessed=bytes_accessed)

    out = pl.pallas_call(
        ncf_kernel,
        out_shape=jax.ShapeDtypeStruct((1, b_pad), jnp.float32),
        grid_spec=pltpu.PrefetchScalarGridSpec(
            num_scalar_prefetch=0,
            grid=grid,
            in_specs=[
                pl.BlockSpec((1, tb), lambda b: (0, b)),              # users
                pl.BlockSpec((1, tb), lambda b: (0, b)),              # items
                # Grid-invariant operands (constant index_map -> fetched once,
                # re-used across all batch tiles).
                # TODO(synk): on v7x with large vocabularies, single-buffer
                # these invariant blocks to halve their VMEM footprint.
                pl.BlockSpec((2 * h_pad, vu_pad), lambda b: (0, 0)),  # user proj
                pl.BlockSpec((2 * h_pad, vi_pad), lambda b: (0, 0)),  # item proj
                pl.BlockSpec((h_pad, 1), lambda b: (0, 0)),           # b1
                pl.BlockSpec((h_pad, 1), lambda b: (0, 0)),           # w2
                pl.BlockSpec((1, 1), lambda b: (0, 0)),               # b2
            ],
            out_specs=pl.BlockSpec((1, tb), lambda b: (0, b)),
        ),
        compiler_params=pltpu.CompilerParams(
            dimension_semantics=("parallel",),
            vmem_limit_bytes=vmem_limit),
        cost_estimate=cost,
    )(u_idx, i_idx, up_pack, ip_pack, b1_col, w2_col, b2)

    out = out[0, :B]
    if y_range is not None:
        out = jax.nn.sigmoid(out) * (y_range[1] - y_range[0]) + y_range[0]
    return jnp.squeeze(out)


def init_params(key, n_users, n_items, n_factors=50, hidden=10):
    """Deterministic init mirroring NCF._init (xavier_uniform, bias=0.01,
    embeddings ~ U(-0.05, 0.05)).  Embedding tables are stored bf16 in HBM."""
    k_ue, k_ie, k_w1, k_w2 = jax.random.split(key, 4)

    def xavier(k, fan_in, fan_out):
        bound = (6.0 / (fan_in + fan_out)) ** 0.5
        # stored pre-transposed as (fan_in, fan_out) so the model does x @ W
        return jax.random.uniform(k, (fan_in, fan_out), jnp.float32, -bound, bound)

    return {
        "user_emb": jax.random.uniform(
            k_ue, (n_users + 1, n_factors), jnp.float32, -0.05, 0.05
        ).astype(jnp.bfloat16),
        "item_emb": jax.random.uniform(
            k_ie, (n_items + 1, n_factors), jnp.float32, -0.05, 0.05
        ).astype(jnp.bfloat16),
        "w1": xavier(k_w1, 2 * n_factors, hidden),
        "b1": jnp.full((1, hidden), 0.01, jnp.float32),
        "w2": xavier(k_w2, hidden, 1),
        "b2": jnp.full((1, 1), 0.01, jnp.float32),
    }


def ncf_reference(users, items, params):
    """Pure-JAX reference for correctness check (same params, f32 compute)."""
    u = jnp.take(params["user_emb"].astype(jnp.float32), users, axis=0)
    i = jnp.take(params["item_emb"].astype(jnp.float32), items, axis=0)
    cat = jnp.concatenate([u, i], axis=1)
    h = jnp.maximum(
        jnp.dot(cat, params["w1"], precision=jax.lax.Precision.HIGHEST)
        + params["b1"], 0.0)
    out = jnp.dot(h, params["w2"], precision=jax.lax.Precision.HIGHEST) + params["b2"]
    return jnp.squeeze(out)


if __name__ == "__main__":
    key = jax.random.PRNGKey(0)
    k_params, k_u, k_i = jax.random.split(key, 3)

    n_users, n_items, n_factors, hidden = 20, 30, 50, 10
    B = 8

    params = init_params(k_params, n_users, n_items, n_factors, hidden)
    users = jax.random.randint(k_u, (B,), 0, n_users + 1, dtype=jnp.int32)
    items = jax.random.randint(k_i, (B,), 0, n_items + 1, dtype=jnp.int32)

    out = ncf_forward(users, items, params)
    jax.block_until_ready(out)

    ref = ncf_reference(users, items, params)
    assert out.shape == (B,), out.shape
    assert jnp.allclose(out, ref, atol=1e-4, rtol=1e-4), (out, ref)
    print("KERNEL_OK")
</pallas_src>

<mosaic_0001>
module attributes {stable_mosaic.version = 11 : i64} {
  func.func @ncf_kernel(%arg0: i32, %arg1: memref<1x128xi32, #tpu.memory_space<vmem>>, %arg2: memref<1x128xi32, #tpu.memory_space<vmem>>, %arg3: memref<256x128xbf16, #tpu.memory_space<vmem>>, %arg4: memref<256x128xbf16, #tpu.memory_space<vmem>>, %arg5: memref<128x1xf32, #tpu.memory_space<vmem>>, %arg6: memref<128x1xf32, #tpu.memory_space<vmem>>, %arg7: memref<1x1xf32, #tpu.memory_space<vmem>>, %arg8: memref<1x128xf32, #tpu.memory_space<vmem>>) attributes {dimension_semantics = [#tpu.dimension_semantics<parallel>], iteration_bounds = array<i64: 1>, scalar_prefetch = 0 : i64, scratch_operands = 0 : i64, tpu.core_type = #tpu.core_type<tc>, window_params = [{transform_indices = @transform_0, window_bounds = array<i64: 1, 128>}, {transform_indices = @transform_1, window_bounds = array<i64: 1, 128>}, {pipeline_mode = #tpu.pipeline_mode<synchronous>, transform_indices = @transform_2, window_bounds = array<i64: 256, 128>}, {pipeline_mode = #tpu.pipeline_mode<synchronous>, transform_indices = @transform_3, window_bounds = array<i64: 256, 128>}, {pipeline_mode = #tpu.pipeline_mode<synchronous>, transform_indices = @transform_4, window_bounds = array<i64: 128, 1>}, {pipeline_mode = #tpu.pipeline_mode<synchronous>, transform_indices = @transform_5, window_bounds = array<i64: 128, 1>}, {pipeline_mode = #tpu.pipeline_mode<synchronous>, transform_indices = @transform_6, window_bounds = array<i64: 1, 1>}, {transform_indices = @transform_7, window_bounds = array<i64: 1, 128>}]} {
    %0 = tpu.iota {dimensions = array<i32: 0>} : vector<128x128xi32>
    %c0 = arith.constant 0 : index
    %c0_0 = arith.constant 0 : index
    %1 = vector.load %arg1[%c0, %c0_0] : memref<1x128xi32, #tpu.memory_space<vmem>>, vector<1x128xi32>
    %2 = vector.broadcast %1 : vector<1x128xi32> to vector<128x128xi32>
    %3 = arith.cmpi eq, %0, %2 : vector<128x128xi32>
    %cst = arith.constant 1.000000e+00 : f32
    %cst_1 = arith.constant 0.000000e+00 : f32
    %4 = vector.broadcast %cst : f32 to vector<128x128xf32>
    %5 = vector.broadcast %cst_1 : f32 to vector<128x128xf32>
    %6 = arith.select %3, %4, %5 : vector<128x128xi1>, vector<128x128xf32>
    %7 = arith.truncf %6 : vector<128x128xf32> to vector<128x128xbf16>
    %8 = tpu.iota {dimensions = array<i32: 0>} : vector<128x128xi32>
    %c0_2 = arith.constant 0 : index
    %c0_3 = arith.constant 0 : index
    %9 = vector.load %arg2[%c0_2, %c0_3] : memref<1x128xi32, #tpu.memory_space<vmem>>, vector<1x128xi32>
    %10 = vector.broadcast %9 : vector<1x128xi32> to vector<128x128xi32>
    %11 = arith.cmpi eq, %8, %10 : vector<128x128xi32>
    %cst_4 = arith.constant 1.000000e+00 : f32
    %cst_5 = arith.constant 0.000000e+00 : f32
    %12 = vector.broadcast %cst_4 : f32 to vector<128x128xf32>
    %13 = vector.broadcast %cst_5 : f32 to vector<128x128xf32>
    %14 = arith.select %11, %12, %13 : vector<128x128xi1>, vector<128x128xf32>
    %15 = arith.truncf %14 : vector<128x128xf32> to vector<128x128xbf16>
    %c0_6 = arith.constant 0 : index
    %c0_7 = arith.constant 0 : index
    %16 = vector.load %arg3[%c0_6, %c0_7] : memref<256x128xbf16, #tpu.memory_space<vmem>>, vector<256x128xbf16>
    %cst_8 = arith.constant dense<0.000000e+00> : vector<256x128xf32>
    %17 = tpu.matmul %16, %7, %cst_8 {dimension_numbers = #tpu.dot_dimension_numbers<[1], [0], [0], [1], [0, 0, 1, 1], [], []>} : vector<256x128xbf16>, vector<128x128xbf16>, vector<256x128xf32> -> vector<256x128xf32>
    %c0_9 = arith.constant 0 : index
    %c0_10 = arith.constant 0 : index
    %18 = vector.load %arg4[%c0_9, %c0_10] : memref<256x128xbf16, #tpu.memory_space<vmem>>, vector<256x128xbf16>
    %cst_11 = arith.constant dense<0.000000e+00> : vector<256x128xf32>
    %19 = tpu.matmul %18, %15, %cst_11 {dimension_numbers = #tpu.dot_dimension_numbers<[1], [0], [0], [1], [0, 0, 1, 1], [], []>} : vector<256x128xbf16>, vector<128x128xbf16>, vector<256x128xf32> -> vector<256x128xf32>
    %20 = vector.extract_strided_slice %17 {offsets = [0, 0], sizes = [128, 128], strides = [1, 1]} : vector<256x128xf32> to vector<128x128xf32>
    %21 = vector.extract_strided_slice %17 {offsets = [128, 0], sizes = [128, 128], strides = [1, 1]} : vector<256x128xf32> to vector<128x128xf32>
    %22 = arith.addf %20, %21 : vector<128x128xf32>
    %23 = vector.extract_strided_slice %19 {offsets = [0, 0], sizes = [128, 128], strides = [1, 1]} : vector<256x128xf32> to vector<128x128xf32>
    %24 = arith.addf %22, %23 : vector<128x128xf32>
    %25 = vector.extract_strided_slice %19 {offsets = [128, 0], sizes = [128, 128], strides = [1, 1]} : vector<256x128xf32> to vector<128x128xf32>
    %26 = arith.addf %24, %25 : vector<128x128xf32>
    %c0_12 = arith.constant 0 : index
    %c0_13 = arith.constant 0 : index
    %27 = vector.load %arg5[%c0_12, %c0_13] : memref<128x1xf32, #tpu.memory_space<vmem>>, vector<128x1xf32>
    %28 = vector.broadcast %27 : vector<128x1xf32> to vector<128x128xf32>
    %29 = arith.addf %26, %28 : vector<128x128xf32>
    %cst_14 = arith.constant 0.000000e+00 : f32
    %30 = vector.broadcast %cst_14 : f32 to vector<128x128xf32>
    %31 = arith.maximumf %29, %30 : vector<128x128xf32>
    %c0_15 = arith.constant 0 : index
    %c0_16 = arith.constant 0 : index
    %32 = vector.load %arg6[%c0_15, %c0_16] : memref<128x1xf32, #tpu.memory_space<vmem>>, vector<128x1xf32>
    %33 = vector.broadcast %32 : vector<128x1xf32> to vector<128x128xf32>
    %34 = arith.mulf %31, %33 : vector<128x128xf32>
    %cst_17 = arith.constant dense<0.000000e+00> : vector<128xf32>
    %35 = vector.multi_reduction <add>, %34, %cst_17 [0] : vector<128x128xf32> to vector<128xf32>
    %36 = vector.shape_cast %35 : vector<128xf32> to vector<1x128xf32>
    %c0_18 = arith.constant 0 : index
    %c0_19 = arith.constant 0 : index
    %37 = vector.load %arg7[%c0_18, %c0_19] : memref<1x1xf32, #tpu.memory_space<vmem>>, vector<1x1xf32>
    %38 = vector.broadcast %37 : vector<1x1xf32> to vector<1x128xf32>
    %39 = arith.addf %36, %38 : vector<1x128xf32>
    %c0_20 = arith.constant 0 : index
    %c0_21 = arith.constant 0 : index
    %40 = vector.load %arg8[%c0_20, %c0_21] : memref<1x128xf32, #tpu.memory_space<vmem>>, vector<1x128xf32>
    tpu.vector_store %arg8[%c0_20, %c0_21], %39 {strides = array<i32>} : memref<1x128xf32, #tpu.memory_space<vmem>>, vector<1x128xf32>,
    return
  }
  func.func @transform_0(%arg0: i32) -> (i32, i32) {
    %c0_i32 = arith.constant 0 : i32
    %c0_i32_0 = arith.constant 0 : i32
    return %c0_i32, %arg0 : i32, i32
  }
  func.func @transform_1(%arg0: i32) -> (i32, i32) {
    %c0_i32 = arith.constant 0 : i32
    %c0_i32_0 = arith.constant 0 : i32
    return %c0_i32, %arg0 : i32, i32
  }
  func.func @transform_2(%arg0: i32) -> (i32, i32) {
    %c0_i32 = arith.constant 0 : i32
    %c0_i32_0 = arith.constant 0 : i32
    %c0_i32_1 = arith.constant 0 : i32
    return %c0_i32, %c0_i32_0 : i32, i32
  }
  func.func @transform_3(%arg0: i32) -> (i32, i32) {
    %c0_i32 = arith.constant 0 : i32
    %c0_i32_0 = arith.constant 0 : i32
    %c0_i32_1 = arith.constant 0 : i32
    return %c0_i32, %c0_i32_0 : i32, i32
  }
  func.func @transform_4(%arg0: i32) -> (i32, i32) {
    %c0_i32 = arith.constant 0 : i32
    %c0_i32_0 = arith.constant 0 : i32
    %c0_i32_1 = arith.constant 0 : i32
    return %c0_i32, %c0_i32_0 : i32, i32
  }
  func.func @transform_5(%arg0: i32) -> (i32, i32) {
    %c0_i32 = arith.constant 0 : i32
    %c0_i32_0 = arith.constant 0 : i32
    %c0_i32_1 = arith.constant 0 : i32
    return %c0_i32, %c0_i32_0 : i32, i32
  }
  func.func @transform_6(%arg0: i32) -> (i32, i32) {
    %c0_i32 = arith.constant 0 : i32
    %c0_i32_0 = arith.constant 0 : i32
    %c0_i32_1 = arith.constant 0 : i32
    return %c0_i32, %c0_i32_0 : i32, i32
  }
  func.func @transform_7(%arg0: i32) -> (i32, i32) {
    %c0_i32 = arith.constant 0 : i32
    %c0_i32_0 = arith.constant 0 : i32
    return %c0_i32, %arg0 : i32, i32
  }
}

</mosaic_0001>

<bundles_post_ra>
// kernel: ncf_forward.1
= control target key start
LH: loop header
LB: loop body
LE: loop exit
PB: predicated region body
PF: predicated region fallthrough
CT: control target
= control target key end

     0   :  { %v29_v0 = vlaneseq  ;;  %v1333_v3 = vmov 0   ;;  %v1334_v13 = vmov 1.0|1.0   ;;  %s1795_s0 = inlined_call_operand.vmem [shape: s32[1,128], index: 0, kind: input, shape index: {}]   ;;  %s1796_s1 = inlined_call_operand.vmem [shape: s32[1,128], index: 1, kind: input, shape index: {}]   ;;  %s1797_s2 = inlined_call_operand.vmem [shape: bf16[256,128], index: 2, kind: input, shape index: {}]   ;;  %s1798_s3 = inlined_call_operand.vmem [shape: bf16[256,128], index: 3, kind: input, shape index: {}]   ;;  %s1799_s6 = inlined_call_operand.<no memory space> [shape: f32[1,1], index: 6, kind: input, shape index: {}]   ;;  %s1800_s4 = inlined_call_operand.vmem [shape: f32[128,1], index: 4, kind: input, shape index: {}]   ;;  %s1801_s5 = inlined_call_operand.vmem [shape: f32[128,1], index: 5, kind: input, shape index: {}]   ;;  %s1802_s7 = inlined_call_operand.vmem [shape: f32[1,128], index: 7, kind: output, shape index: {}]  }
   0x1   :  { %v1378_v1 = vld [vmem:[%s1795_s0] ss:$0 sm:$0xff]  ;;  %1299 = vset.pattern.permute.xlu0 %v1333_v3  ;;  %1300 = vset.pattern.permute.xlu1 %v1333_v3  ;;  %v12_v4 = vstv %s1799_s6  ;;  %v763_v33 = vld [vmem:[%s1800_s4 + $0x8] sm:$0xff]  ;;  %v764_v36 = vld [vmem:[%s1800_s4 + $0x10] sm:$0xff] }
   0x2   :  { %v1383_v2 = vld [vmem:[%s1796_s1] ss:$0 sm:$0xff]  ;;  %v1388_v5 = vshrl.u32 %v29_v0, 7  ;;  %13 = vst [vmem:[#allocation2] sm:$0x1] %v12_v4  ;;  %790 = vperm.xlu1 %1300, %v764_v36   ;;  %v765_v38 = vld [vmem:[%s1800_s4 + $0x18] sm:$0xff] }
   0x3   :  { %v1301_v6 = vld [vmem:[%s1797_s2] sm:$0xff]   ;;  %v1303_v41 = vld [vmem:[%s1797_s2 + $0x8] sm:$0xff]   ;;  %v1305_v44 = vld [vmem:[%s1797_s2 + $0x10] sm:$0xff]  }
   0x4   :  { %v1302_v7 = vld [vmem:[%s1798_s3] sm:$0xff]   ;;  %v31_v8 = vadd.s32 8, %v1388_v5  ;;  %vm51_vm0 = vcmp.eq.s32.totalorder %v1388_v5, %v1378_v1  ;;  %v32_v9 = vadd.s32 16, %v1388_v5  ;;  %1169 = vmatprep.mubr.bf16.mxu1 %v1301_v6  ;;  %vm96_vm1 = vcmp.eq.s32.totalorder %v1388_v5, %v1383_v2  ;;  %v767_v42 = vld [vmem:[%s1800_s4 + $0x28] sm:$0xff]  ;;  %v892_v45 = vld [vmem:[%s1801_s5 + $0x10] sm:$0xff] }
   0x5   :  { %v33_v10 = vadd.s32 24, %v1388_v5  ;;  %v34_v11 = vadd.s32 32, %v1388_v5  ;;  %v35_v12 = vadd.s32 40, %v1388_v5  ;;  %1217 = vmatprep.mubr.bf16.mxu0 %v1302_v7  ;;  %v36_v14 = vadd.s32 48, %v1388_v5  ;;  %v762_v29 = vld [vmem:[%s1800_s4] sm:$0xff]  ;;  %v1304_v43 = vld [vmem:[%s1798_s3 + $0x8] sm:$0xff]  }
   0x6   :  { %vm52_vm2 = vcmp.eq.s32.totalorder %v31_v8, %v1378_v1  ;;  %vm97_vm3 = vcmp.eq.s32.totalorder %v31_v8, %v1383_v2  ;;  %vm53_vm4 = vcmp.eq.s32.totalorder %v32_v9, %v1378_v1  ;;  %vm98_vm7 = vcmp.eq.s32.totalorder %v32_v9, %v1383_v2  ;;  %780 = vperm.xlu0 %1299, %v762_v29   ;;  %v766_v37 = vld [vmem:[%s1800_s4 + $0x20] sm:$0xff]  ;;  %v1306_v46 = vld [vmem:[%s1798_s3 + $0x10] sm:$0xff]   ;;  %v891_v47 = vld [vmem:[%s1801_s5 + $0x8] sm:$0xff] }
   0x7   :  { %vm1057_vm5 = vmpackc.low %vm52_vm2, %vm51_vm0  ;;  %vm54_vm6 = vcmp.eq.s32.totalorder %v33_v10, %v1378_v1  ;;  %vm99_vm8 = vcmp.eq.s32.totalorder %v33_v10, %v1383_v2  ;;  %vm55_vm10 = vcmp.eq.s32.totalorder %v34_v11, %v1378_v1  ;;  %vm56_vm11 = vcmp.eq.s32.totalorder %v35_v12, %v1378_v1  ;;  %795 = vperm.xlu1 %1300, %v765_v38   ;;  %v890_v40 = vld [vmem:[%s1801_s5] sm:$0xff]  ;;  %v768_v48 = vld [vmem:[%s1800_s4 + $0x30] sm:$0xff] }
   0x8   :  { %1153 = vmatprep.subr.msk.bf16.mxu1 %vm1057_vm5, %v1334_v13  ;;  %vm1089_vm9 = vmpackc.low %vm97_vm3, %vm96_vm1  ;;  %v37_v15 = vadd.s32 56, %v1388_v5  ;;  %vm100_vm13 = vcmp.eq.s32.totalorder %v34_v11, %v1383_v2  ;;  %vm101_vm14 = vcmp.eq.s32.totalorder %v35_v12, %v1383_v2  ;;  %vm57_vm2 = vcmp.eq.s32.totalorder %v36_v14, %v1378_v1  ;;  %v893_v49 = vld [vmem:[%s1801_s5 + $0x18] sm:$0xff]  ;;  %v1309_v52 = vld [vmem:[%s1797_s2 + $0x20] sm:$0xff]  }
   0x9   :  { %1201 = vmatprep.subr.msk.bf16.mxu0 %vm1089_vm9, %v1334_v13  ;;  %1154 = vmatpush3.bf16.msk.msra.mxu1 %vm1057_vm5, %v1334_v13  ;;  %vm1059_vm12 = vmpackc.low %vm54_vm6, %vm53_vm4  ;;  %v38_v18 = vadd.s32 64, %v1388_v5  ;;  %v39_v19 = vadd.s32 72, %v1388_v5  ;;  %vm102_vm4 = vcmp.eq.s32.totalorder %v36_v14, %v1383_v2  ;;  %v40_v22 = vadd.s32 80, %v1388_v5  ;;  %v1307_v50 = vld [vmem:[%s1797_s2 + $0x18] sm:$0xff]   ;;  %v1310_v54 = vld [vmem:[%s1798_s3 + $0x20] sm:$0xff]  }
   0xa   :  { %1202 = vmatpush3.bf16.msk.msra.mxu0 %vm1089_vm9, %v1334_v13  ;;  %1155 = vmatprep.subr.msk.bf16.mxu1 %vm1059_vm12, %v1334_v13  ;;  %vm1091_vm15 = vmpackc.low %vm99_vm8, %vm98_vm7  ;;  %vm58_vm3 = vcmp.eq.s32.totalorder %v37_v15, %v1378_v1  ;;  %vm103_vm5 = vcmp.eq.s32.totalorder %v37_v15, %v1383_v2  ;;  %v41_v23 = vadd.s32 88, %v1388_v5  ;;  %v42_v26 = vadd.s32 96, %v1388_v5  ;;  %v1308_v51 = vld [vmem:[%s1798_s3 + $0x18] sm:$0xff]   ;;  %v894_v55 = vld [vmem:[%s1801_s5 + $0x20] sm:$0xff] }
   0xb   :  { %1203 = vmatprep.subr.msk.bf16.mxu0 %vm1091_vm15, %v1334_v13  ;;  %vm1427_vm0 = vmpackc.low %vm56_vm11, %vm55_vm10  ;;  %vm59_vm8 = vcmp.eq.s32.totalorder %v38_v18, %v1378_v1  ;;  %vm60_vm9 = vcmp.eq.s32.totalorder %v39_v19, %v1378_v1  ;;  %vm104_vm10 = vcmp.eq.s32.totalorder %v38_v18, %v1383_v2  ;;  %vm105_vm11 = vcmp.eq.s32.totalorder %v39_v19, %v1383_v2  ;;  %v769_v53 = vld [vmem:[%s1800_s4 + $0x38] sm:$0xff]  ;;  %v770_v56 = vld [vmem:[%s1800_s4 + $0x40] sm:$0xff] }
   0xc   :  { %vm1431_vm1 = vmpackc.low %vm101_vm14, %vm100_vm13  ;;  %vm61_vm14 = vcmp.eq.s32.totalorder %v40_v22, %v1378_v1  ;;  %v43_v27 = vadd.s32 104, %v1388_v5  ;;  %v44_v31 = vadd.s32 112, %v1388_v5  ;;  %v45_v32 = vadd.s32 120, %v1388_v5  ;;  %785 = vperm.xlu0 %1299, %v763_v33   ;;  %805 = vperm.xlu1 %1300, %v767_v42   ;;  %v895_v57 = vld [vmem:[%s1801_s5 + $0x28] sm:$0xff]  ;;  %v1313_v60 = vld [vmem:[%s1797_s2 + $0x30] sm:$0xff]  }
   0xd   :  { %1156 = vmatpush3.bf16.msk.msra.mxu1 %vm1059_vm12, %v1334_v13  ;;  %vm1449_vm6 = vmpackc.low %vm58_vm3, %vm57_vm2  ;;  %v1311_v58 = vld [vmem:[%s1797_s2 + $0x28] sm:$0xff]   ;;  %v1314_v62 = vld [vmem:[%s1798_s3 + $0x30] sm:$0xff]  }
   0xe   :  { %1204 = vmatpush3.bf16.msk.msra.mxu0 %vm1091_vm15, %v1334_v13  ;;  %1157 = vmatprep.subr.msk.bf16.mxu1 %vm1427_vm0, %v1334_v13  ;;  %vm1453_vm7 = vmpackc.low %vm103_vm5, %vm102_vm4  ;;  %vm62_vm15 = vcmp.eq.s32.totalorder %v41_v23, %v1378_v1  ;;  %vm63_vm4 = vcmp.eq.s32.totalorder %v42_v26, %v1378_v1  ;;  %vm64_vm5 = vcmp.eq.s32.totalorder %v43_v27, %v1378_v1  ;;  %v1312_v59 = vld [vmem:[%s1798_s3 + $0x28] sm:$0xff]   ;;  %v896_v63 = vld [vmem:[%s1801_s5 + $0x30] sm:$0xff] }
   0xf   :  { %1205 = vmatprep.subr.msk.bf16.mxu0 %vm1431_vm1, %v1334_v13  ;;  %vm1475_vm12 = vmpackc.low %vm60_vm9, %vm59_vm8  ;;  %v771_v61 = vld [vmem:[%s1800_s4 + $0x48] sm:$0xff]  ;;  %v772_v0 = vld [vmem:[%s1800_s4 + $0x50] sm:$0xff] }
  0x10   :  { %vm1479_vm13 = vmpackc.low %vm105_vm11, %vm104_vm10  ;;  %vm65_vm10 = vcmp.eq.s32.totalorder %v44_v31, %v1378_v1  ;;  %vm66_vm11 = vcmp.eq.s32.totalorder %v45_v32, %v1378_v1  ;;  %800 = vperm.xlu0 %1299, %v766_v37   ;;  %913 = vperm.xlu1 %1300, %v891_v47   ;;  %v897_v1 = vld [vmem:[%s1801_s5 + $0x38] sm:$0xff]  ;;  %v1317_v4 = vld [vmem:[%s1797_s2 + $0x40] sm:$0xff]  }
  0x11   :  { %1158 = vmatpush3.bf16.msk.msra.mxu1 %vm1427_vm0, %v1334_v13  ;;  %vm106_vm0 = vcmp.eq.s32.totalorder %v40_v22, %v1383_v2  ;;  %vm1501_vm2 = vmpackc.low %vm62_vm15, %vm61_vm14  ;;  %v1316_v3 = vld [vmem:[%s1798_s3 + $0x38] sm:$0xff]   ;;  %v1318_v7 = vld [vmem:[%s1798_s3 + $0x40] sm:$0xff]  }
  0x12   :  { %1206 = vmatpush3.bf16.msk.msra.mxu0 %vm1431_vm1, %v1334_v13  ;;  %1159 = vmatprep.subr.msk.bf16.mxu1 %vm1449_vm6, %v1334_v13  ;;  %vm107_vm1 = vcmp.eq.s32.totalorder %v41_v23, %v1383_v2  ;;  %vm1533_vm8 = vmpackc.low %vm64_vm5, %vm63_vm4  ;;  %v773_v6 = vld [vmem:[%s1800_s4 + $0x58] sm:$0xff]  ;;  %v898_v8 = vld [vmem:[%s1801_s5 + $0x40] sm:$0xff] }
  0x13   :  { %1207 = vmatprep.subr.msk.bf16.mxu0 %vm1453_vm7, %v1334_v13  ;;  %vm1508_vm3 = vmpackc.low %vm107_vm1, %vm106_vm0  ;;  %v774_v9 = vld [vmem:[%s1800_s4 + $0x60] sm:$0xff]  ;;  %v899_v10 = vld [vmem:[%s1801_s5 + $0x48] sm:$0xff] }
  0x14   :  { %vm1071_vm14 = vmpackc.low %vm66_vm11, %vm65_vm10  ;;  %908 = vperm.xlu0 %1299, %v890_v40   ;;  %923 = vperm.xlu1 %1300, %v893_v49   ;;  %v1319_v11 = vld [vmem:[%s1797_s2 + $0x48] sm:$0xff]   ;;  %v1322_v15 = vld [vmem:[%s1798_s3 + $0x50] sm:$0xff]  }
  0x15   :  { %1160 = vmatpush3.bf16.msk.msra.mxu1 %vm1449_vm6, %v1334_v13  ;;  %vm108_vm6 = vcmp.eq.s32.totalorder %v42_v26, %v1383_v2  ;;  %v1320_v12 = vld [vmem:[%s1798_s3 + $0x48] sm:$0xff]   ;;  %v900_v16 = vld [vmem:[%s1801_s5 + $0x50] sm:$0xff]  ;;  %v901_v18 = vld [vmem:[%s1801_s5 + $0x58] sm:$0xff] }
  0x16   :  { %1208 = vmatpush3.bf16.msk.msra.mxu0 %vm1453_vm7, %v1334_v13  ;;  %1161 = vmatprep.subr.msk.bf16.mxu1 %vm1475_vm12, %v1334_v13  ;;  %vm109_vm7 = vcmp.eq.s32.totalorder %v43_v27, %v1383_v2  ;;  %v775_v14 = vld [vmem:[%s1800_s4 + $0x68] sm:$0xff]  ;;  %v776_v17 = vld [vmem:[%s1800_s4 + $0x70] sm:$0xff]  ;;  %v1323_v19 = vld [vmem:[%s1797_s2 + $0x58] sm:$0xff]  }
  0x17   :  { %1209 = vmatprep.subr.msk.bf16.mxu0 %vm1479_vm13, %v1334_v13  ;;  %vm1537_vm9 = vmpackc.low %vm109_vm7, %vm108_vm6  ;;  %v1324_v20 = vld [vmem:[%s1798_s3 + $0x58] sm:$0xff]   ;;  %v1325_v21 = vld [vmem:[%s1797_s2 + $0x60] sm:$0xff]  }
  0x18   :  { %918 = vperm.xlu0 %1299, %v892_v45   ;;  %928 = vperm.xlu1 %1300, %v894_v55   ;;  %v777_v22 = vld [vmem:[%s1800_s4 + $0x78] sm:$0xff]  ;;  %v1326_v23 = vld [vmem:[%s1798_s3 + $0x60] sm:$0xff]   ;;  %v904_v25 = vld [vmem:[%s1801_s5 + $0x70] sm:$0xff] }
  0x19   :  { %1162 = vmatpush3.bf16.msk.msra.mxu1 %vm1475_vm12, %v1334_v13  ;;  %vm110_vm12 = vcmp.eq.s32.totalorder %v44_v31, %v1383_v2  ;;  %v902_v24 = vld [vmem:[%s1801_s5 + $0x60] sm:$0xff]  ;;  %v903_v26 = vld [vmem:[%s1801_s5 + $0x68] sm:$0xff]  ;;  %v1329_v29 = vld [vmem:[%s1797_s2 + $0x70] sm:$0xff]  }
  0x1a   :  { %1210 = vmatpush3.bf16.msk.msra.mxu0 %vm1479_vm13, %v1334_v13  ;;  %1163 = vmatprep.subr.msk.bf16.mxu1 %vm1501_vm2, %v1334_v13  ;;  %vm111_vm13 = vcmp.eq.s32.totalorder %v45_v32, %v1383_v2  ;;  %v1315_v2 = vld [vmem:[%s1797_s2 + $0x38] sm:$0xff]   ;;  %v1327_v27 = vld [vmem:[%s1797_s2 + $0x68] sm:$0xff]   ;;  %v1023_v30 = vld [vmem:[#allocation2] sm:$0x1] }
  0x1b   :  { %1211 = vmatprep.subr.msk.bf16.mxu0 %vm1508_vm3, %v1334_v13  ;;  %vm1566_vm15 = vmpackc.low %vm111_vm13, %vm110_vm12  ;;  %v1328_v28 = vld [vmem:[%s1798_s3 + $0x68] sm:$0xff]   ;;  %v1330_v31 = vld [vmem:[%s1798_s3 + $0x70] sm:$0xff]  }
  0x1c   :  { %810 = vperm.xlu0 %1299, %v768_v48   ;;  %933 = vperm.xlu1 %1300, %v895_v57   ;;  %v905_v32 = vld [vmem:[%s1801_s5 + $0x78] sm:$0xff] }
  0x1d   :  { %1164 = vmatpush3.bf16.msk.msra.mxu1 %vm1501_vm2, %v1334_v13  ;;  %v1331_v33 = vld [vmem:[%s1797_s2 + $0x78] sm:$0xff]  }
  0x1e   :  { %1212 = vmatpush3.bf16.msk.msra.mxu0 %vm1508_vm3, %v1334_v13  ;;  %1165 = vmatprep.subr.msk.bf16.mxu1 %vm1533_vm8, %v1334_v13  ;;  %v1332_v34 = vld [vmem:[%s1798_s3 + $0x78] sm:$0xff]  }
  0x1f   :  { %1213 = vmatprep.subr.msk.bf16.mxu0 %vm1537_vm9, %v1334_v13 }
  0x20   :  { %815 = vperm.xlu0 %1299, %v769_v53   ;;  %938 = vperm.xlu1 %1300, %v896_v63  }
  0x21   :  { %1166 = vmatpush3.bf16.msk.msra.mxu1 %vm1533_vm8, %v1334_v13 }
  0x22   :  { %1214 = vmatpush3.bf16.msk.msra.mxu0 %vm1537_vm9, %v1334_v13  ;;  %1167 = vmatprep.subr.msk.bf16.mxu1 %vm1071_vm14, %v1334_v13 }
  0x23   :  { %1215 = vmatprep.subr.msk.bf16.mxu0 %vm1566_vm15, %v1334_v13 }
  0x24   :  { %820 = vperm.xlu0 %1299, %v770_v56   ;;  %943 = vperm.xlu1 %1300, %v897_v1  }
  0x25   :  { %1168 = vmatpush3.bf16.msk.msra.mxu1 %vm1071_vm14, %v1334_v13 }
  0x26   :  { %1216 = vmatpush3.bf16.msk.msra.mxu0 %vm1566_vm15, %v1334_v13  ;;  %v1321_v13 = vld [vmem:[%s1797_s2 + $0x50] sm:$0xff]  }
  0x28   :  { %1170 = vmatmul.mubr.bf16.vlgmr.msra.gmra.mrb[0].mxu1 %v1303_v41  ;;  %825 = vperm.xlu0 %1299, %v771_v61  }
  0x29   :  { %1218 = vmatmul.mubr.bf16.vlgmr.msra.gmra.mrb[0].mxu0 %v1304_v43  ;;  %1173 = vmatprep.mubr.bf16.mxu1 %v1305_v44 }
  0x2a   :  { %1221 = vmatprep.mubr.bf16.mxu0 %v1306_v46  ;;  %948 = vperm.xlu1 %1300, %v898_v8  }
  0x2c   :  { %830 = vperm.xlu0 %1299, %v772_v0  }
  0x2e   :  { %953 = vperm.xlu1 %1300, %v899_v10  }
  0x30   :  { %1174 = vmatmul.mubr.bf16.gmra.mrb[4].mxu1 %v1307_v50  ;;  %835 = vperm.xlu0 %1299, %v773_v6  }
  0x31   :  { %1222 = vmatmul.mubr.bf16.gmra.mrb[4].mxu0 %v1308_v51  ;;  %1177 = vmatprep.mubr.bf16.mxu1 %v1309_v52 }
  0x32   :  { %1225 = vmatprep.mubr.bf16.mxu0 %v1310_v54  ;;  %958 = vperm.xlu1 %1300, %v900_v16  }
  0x34   :  { %840 = vperm.xlu0 %1299, %v774_v9  }
  0x36   :  { %963 = vperm.xlu1 %1300, %v901_v18  }
  0x38   :  { %1178 = vmatmul.mubr.bf16.gmra.mrb[8].mxu1 %v1311_v58  ;;  %845 = vperm.xlu0 %1299, %v775_v14  }
  0x39   :  { %1226 = vmatmul.mubr.bf16.gmra.mrb[8].mxu0 %v1312_v59  ;;  %1181 = vmatprep.mubr.bf16.mxu1 %v1313_v60 }
  0x3a   :  { %1229 = vmatprep.mubr.bf16.mxu0 %v1314_v62  ;;  %968 = vperm.xlu1 %1300, %v902_v24  }
  0x3c   :  { %850 = vperm.xlu0 %1299, %v776_v17  }
  0x3e   :  { %973 = vperm.xlu1 %1300, %v903_v26  }
  0x40   :  { %1182 = vmatmul.mubr.bf16.gmra.mrb[12].mxu1 %v1315_v2  ;;  %855 = vperm.xlu0 %1299, %v777_v22  }
  0x41   :  { %1230 = vmatmul.mubr.bf16.gmra.mrb[12].mxu0 %v1316_v3  ;;  %1185 = vmatprep.mubr.bf16.mxu1 %v1317_v4 }
  0x42   :  { %1233 = vmatprep.mubr.bf16.mxu0 %v1318_v7  ;;  %983 = vperm.xlu1 %1300, %v905_v32  }
  0x44   :  { %978 = vperm.xlu0 %1299, %v904_v25  }
  0x48   :  { %1186 = vmatmul.mubr.bf16.gmra.mrb[0].mxu1 %v1319_v11  ;;  %1026 = vperm.xlu0 %1299, %v1023_v30  }
  0x49   :  { %1234 = vmatmul.mubr.bf16.gmra.mrb[0].mxu0 %v1320_v12  ;;  %1189 = vmatprep.mubr.bf16.mxu1 %v1321_v13 }
  0x4a   :  { %1237 = vmatprep.mubr.bf16.mxu0 %v1322_v15 }
  0x50   :  { %1190 = vmatmul.mubr.bf16.gmra.mrb[4].mxu1 %v1323_v19 }
  0x51   :  { %1238 = vmatmul.mubr.bf16.gmra.mrb[4].mxu0 %v1324_v20  ;;  %1193 = vmatprep.mubr.bf16.mxu1 %v1325_v21 }
  0x52   :  { %1241 = vmatprep.mubr.bf16.mxu0 %v1326_v23 }
  0x58   :  { %1194 = vmatmul.mubr.bf16.gmra.mrb[8].mxu1 %v1327_v27 }
  0x59   :  { %1242 = vmatmul.mubr.bf16.gmra.mrb[8].mxu0 %v1328_v28  ;;  %1197 = vmatprep.mubr.bf16.mxu1 %v1329_v29 }
  0x5a   :  { %1245 = vmatprep.mubr.bf16.mxu0 %v1330_v31 }
  0x60   :  { %1198 = vmatmul.mubr.bf16.gmra.mrb[12].mxu1 %v1331_v33 }
  0x61   :  { %1246 = vmatmul.mubr.bf16.gmra.mrb[12].mxu0 %v1332_v34 }
  0x81   :  { %v791_v36 = vpop.permute.xlu1 %790 }
  0x85   :  { %v781_v35 = vpop.permute.xlu0 %780 }
  0x86   :  { %v796_v38 = vpop.permute.xlu1 %795 }
  0x8b   :  { %v786_v37 = vpop.permute.xlu0 %785  ;;  %v806_v40 = vpop.permute.xlu1 %805 }
  0x8f   :  { %v801_v39 = vpop.permute.xlu0 %800  ;;  %v914_v42 = vpop.permute.xlu1 %913 }
  0x93   :  { %v909_v41 = vpop.permute.xlu0 %908  ;;  %v924_v44 = vpop.permute.xlu1 %923 }
  0x97   :  { %v919_v43 = vpop.permute.xlu0 %918  ;;  %v929_v46 = vpop.permute.xlu1 %928 }
  0x9b   :  { %v811_v45 = vpop.permute.xlu0 %810  ;;  %v1755_v48 = vpop.permute.xlu1 %933 }
  0x9f   :  { %v816_v47 = vpop.permute.xlu0 %815  ;;  %v1759_v50 = vpop.permute.xlu1 %938 }
  0xa3   :  { %v1757_v49 = vpop.permute.xlu0 %820  ;;  %v1763_v52 = vpop.permute.xlu1 %943 }
  0xa7   :  { %v1761_v51 = vpop.permute.xlu0 %825 }
  0xa9   :  { %v1767_v54 = vpop.permute.xlu1 %948 }
  0xab   :  { %v1765_v53 = vpop.permute.xlu0 %830 }
  0xad   :  { %v1771_v56 = vpop.permute.xlu1 %953 }
  0xaf   :  { %v1769_v55 = vpop.permute.xlu0 %835 }
  0xb1   :  { %v1775_v12 = vpop.permute.xlu1 %958 }
  0xb3   :  { %v1773_v9 = vpop.permute.xlu0 %840 }
 0x11b   :  { %v1187_v57 = vpop.f32.mrb[0].mxu1 }
 0x11c   :  { %v1235_v58 = vpop.f32.mrb[0].mxu0  ;;  %v362_v59 = vpop.f32.mrb[1].mxu1 }
 0x11d   :  { %v1249_v60 = vadd.f32 %v1235_v58, %v1187_v57  ;;  %v651_v61 = vpop.f32.mrb[1].mxu0  ;;  %v1188_v62 = vpop.f32.mrb[2].mxu1 }
 0x11e   :  { %v1250_v63 = vadd.f32 %v651_v61, %v362_v59  ;;  %v1236_v0 = vpop.f32.mrb[2].mxu0  ;;  %v365_v1 = vpop.f32.mrb[3].mxu1 }
 0x11f   :  { %v860_v2 = vadd.f32 %v1249_v60, %v791_v36  ;;  %v1251_v3 = vadd.f32 %v1236_v0, %v1188_v62  ;;  %v654_v4 = vpop.f32.mrb[3].mxu0  ;;  %v964_v58 = vpop.permute.xlu1 %963 }
 0x120   :  { %v858_v6 = vadd.f32 %v1250_v63, %v781_v35  ;;  %v1252_v7 = vadd.f32 %v654_v4, %v365_v1  ;;  %v1777_v35 = vpop.permute.xlu0 %845 }
 0x121   :  { %v861_v8 = vadd.f32 %v1251_v3, %v796_v38  ;;  %v876_v13 = vmax.f32 %v860_v2, 0.0 }
 0x122   :  { %v874_v10 = vmax.f32 %v858_v6, 0.0  ;;  %v859_v11 = vadd.f32 %v1252_v7, %v786_v37 }
 0x123   :  { %v1191_v14 = vpop.f32.mrb[4].mxu1  ;;  %v877_v18 = vmax.f32 %v861_v8, 0.0  ;;  %v988_v27 = vmul.f32 %v919_v43, %v876_v13 }
 0x124   :  { %v875_v15 = vmax.f32 %v859_v11, 0.0  ;;  %v1239_v16 = vpop.f32.mrb[4].mxu0  ;;  %v378_v17 = vpop.f32.mrb[5].mxu1  ;;  %v986_v22 = vmul.f32 %v909_v41, %v874_v10 }
 0x125   :  { %v1253_v19 = vadd.f32 %v1239_v16, %v1191_v14  ;;  %v667_v20 = vpop.f32.mrb[5].mxu0  ;;  %v1192_v21 = vpop.f32.mrb[6].mxu1  ;;  %v989_v34 = vmul.f32 %v924_v44, %v877_v18 }
 0x126   :  { %v987_v23 = vmul.f32 %v914_v42, %v875_v15  ;;  %v1254_v24 = vadd.f32 %v667_v20, %v378_v17  ;;  %v1240_v25 = vpop.f32.mrb[6].mxu0  ;;  %v381_v26 = vpop.f32.mrb[7].mxu1 }
 0x127   :  { %v1255_v28 = vadd.f32 %v1240_v25, %v1192_v21  ;;  %v670_v29 = vpop.f32.mrb[7].mxu0  ;;  %v864_v31 = vadd.f32 %v1253_v19, %v811_v45  ;;  %v851_v13 = vpop.permute.xlu0 %850 }
 0x128   :  { %v1002_v30 = vadd.f32 %v987_v23, %v986_v22  ;;  %v862_v32 = vadd.f32 %v1254_v24, %v801_v39  ;;  %v1256_v33 = vadd.f32 %v670_v29, %v381_v26  ;;  %v969_v17 = vpop.permute.xlu1 %968 }
 0x129   :  { %v865_v38 = vadd.f32 %v1255_v28, %v816_v47  ;;  %v880_v42 = vmax.f32 %v864_v31, 0.0 }
 0x12a   :  { %v1003_v36 = vadd.f32 %v1002_v30, %v988_v27  ;;  %v878_v37 = vmax.f32 %v862_v32, 0.0  ;;  %v863_v57 = vadd.f32 %v1256_v33, %v806_v40 }
 0x12b   :  { %v1195_v41 = vpop.f32.mrb[8].mxu1  ;;  %v881_v1 = vmax.f32 %v865_v38, 0.0 }
 0x12c   :  { %v990_v59 = vmul.f32 %v929_v46, %v878_v37  ;;  %v1004_v60 = vadd.f32 %v1003_v36, %v989_v34  ;;  %v879_v61 = vmax.f32 %v863_v57, 0.0  ;;  %v1243_v43 = vpop.f32.mrb[8].mxu0  ;;  %v394_v62 = vpop.f32.mrb[9].mxu1  ;;  %v992_v46 = vmul.f32 %v1759_v50, %v880_v42 }
 0x12d   :  { %v1257_v63 = vadd.f32 %v1243_v43, %v1195_v41  ;;  %v683_v0 = vpop.f32.mrb[9].mxu0  ;;  %v1196_v45 = vpop.f32.mrb[10].mxu1  ;;  %v993_v14 = vmul.f32 %v1763_v52, %v881_v1 }
 0x12e   :  { %v1005_v39 = vadd.f32 %v1004_v60, %v990_v59  ;;  %v991_v44 = vmul.f32 %v1755_v48, %v879_v61  ;;  %v1258_v2 = vadd.f32 %v683_v0, %v394_v62  ;;  %v1244_v3 = vpop.f32.mrb[10].mxu0  ;;  %v397_v4 = vpop.f32.mrb[11].mxu1 }
 0x12f   :  { %v868_v40 = vadd.f32 %v1257_v63, %v1765_v53  ;;  %v1259_v47 = vadd.f32 %v1244_v3, %v1196_v45  ;;  %v686_v6 = vpop.f32.mrb[11].mxu0  ;;  %v856_v34 = vpop.permute.xlu0 %855 }
 0x130   :  { %v1006_v7 = vadd.f32 %v1005_v39, %v991_v44  ;;  %v866_v8 = vadd.f32 %v1258_v2, %v1757_v49  ;;  %v1260_v10 = vadd.f32 %v686_v6, %v397_v4 }
 0x131   :  { %v869_v11 = vadd.f32 %v1259_v47, %v1769_v55  ;;  %v884_v18 = vmax.f32 %v868_v40, 0.0 }
 0x132   :  { %v1007_v15 = vadd.f32 %v1006_v7, %v992_v46  ;;  %v882_v48 = vmax.f32 %v866_v8, 0.0  ;;  %v867_v16 = vadd.f32 %v1260_v10, %v1761_v51 }
 0x133   :  { %v1199_v53 = vpop.f32.mrb[12].mxu1  ;;  %v885_v49 = vmax.f32 %v869_v11, 0.0  ;;  %v996_v51 = vmul.f32 %v1775_v12, %v884_v18  ;;  %v979_v63 = vpop.permute.xlu0 %978 }
 0x134   :  { %v994_v19 = vmul.f32 %v1767_v54, %v882_v48  ;;  %v1008_v20 = vadd.f32 %v1007_v15, %v993_v14  ;;  %v883_v50 = vmax.f32 %v867_v16, 0.0  ;;  %v1247_v21 = vpop.f32.mrb[12].mxu0  ;;  %v410_v22 = vpop.f32.mrb[13].mxu1 }
 0x135   :  { %v1261_v23 = vadd.f32 %v1247_v21, %v1199_v53  ;;  %v699_v24 = vpop.f32.mrb[13].mxu0  ;;  %v1200_v55 = vpop.f32.mrb[14].mxu1  ;;  %v997_v36 = vmul.f32 %v964_v58, %v885_v49 }
 0x136   :  { %v1009_v25 = vadd.f32 %v1008_v20, %v994_v19  ;;  %v995_v52 = vmul.f32 %v1771_v56, %v883_v50  ;;  %v1262_v26 = vadd.f32 %v699_v24, %v410_v22  ;;  %v1248_v27 = vpop.f32.mrb[14].mxu0  ;;  %v413_v28 = vpop.f32.mrb[15].mxu1 }
 0x137   :  { %v1263_v29 = vadd.f32 %v1248_v27, %v1200_v55  ;;  %v702_v30 = vpop.f32.mrb[15].mxu0  ;;  %v872_v54 = vadd.f32 %v1261_v23, %v851_v13  ;;  %v974_v56 = vpop.permute.xlu1 %973 }
 0x138   :  { %v1010_v31 = vadd.f32 %v1009_v25, %v995_v52  ;;  %v870_v32 = vadd.f32 %v1262_v26, %v1773_v9  ;;  %v1264_v33 = vadd.f32 %v702_v30, %v413_v28  ;;  %v1027_v40 = vpop.permute.xlu0 %1026 }
 0x139   :  { %v873_v57 = vadd.f32 %v1263_v29, %v856_v34  ;;  %v888_v42 = vmax.f32 %v872_v54, 0.0 }
 0x13a   :  { %v1011_v37 = vadd.f32 %v1010_v31, %v996_v51  ;;  %v886_v38 = vmax.f32 %v870_v32, 0.0  ;;  %v871_v41 = vadd.f32 %v1264_v33, %v1777_v35  ;;  %v1031_v35 = vsub.s32 0, %v1388_v5 }
 0x13b   :  { %v889_v43 = vmax.f32 %v873_v57, 0.0  ;;  %v1000_v0 = vmul.f32 %v979_v63, %v888_v42  ;;  %v984_v9 = vpop.permute.xlu1 %983 }
 0x13c   :  { %v998_v59 = vmul.f32 %v969_v17, %v886_v38  ;;  %v1012_v60 = vadd.f32 %v1011_v37, %v997_v36  ;;  %v887_v61 = vmax.f32 %v871_v41, 0.0  ;;  %v1032_v6 = vrot.slane %v1027_v40, %v1031_v35 }
 0x13d   :  { %v1001_v39 = vmul.f32 %v984_v9, %v889_v43 }
 0x13e   :  { %v1013_v12 = vadd.f32 %v1012_v60, %v998_v59  ;;  %v999_v62 = vmul.f32 %v974_v56, %v887_v61 }
 0x140   :  { %v1014_v45 = vadd.f32 %v1013_v12, %v999_v62 }
 0x142   :  { %v1015_v1 = vadd.f32 %v1014_v45, %v1000_v0 }
 0x144   :  { %v1016_v58 = vadd.f32 %v1015_v1, %v1001_v39 }
 0x146   :  { %v1017_v44 = vrot.slane %v1016_v58, 4 }
 0x148   :  { %v1018_v2 = vadd.f32 %v1017_v44, %v1016_v58 }
 0x14a   :  { %v1019_v3 = vrot.slane %v1018_v2, 2 }
 0x14c   :  { %v1020_v4 = vadd.f32 %v1019_v3, %v1018_v2 }
 0x14e   :  { %v1021_v47 = vrot.slane %v1020_v4, 1 }
 0x150   :  { %v1022_v46 = vadd.f32 %v1021_v47, %v1020_v4 }
 0x152   :  { %v1033_v7 = vadd.f32 %v1032_v6, %v1022_v46 }
 0x154   :  { %1034 = vst [vmem:[%s1802_s7] sm:$0x1] %v1033_v7 }

</bundles_post_ra>
